<compile_context>
chip_gen: v7x
topology: tpu7x:2x2x1
jax: 0.10.0
libtpu: 0.0.40
codegen_flags: <defaults>
</compile_context>

<pallas_src>
import functools

import jax
import jax.numpy as jnp
from jax.experimental import pallas as pl
from jax.experimental.pallas import tpu as pltpu


def _round_up(x, m):
    return (x + m - 1) // m * m


def patch_embed_kernel(p_ref, w_ref, b_ref, o_ref):
    # p_ref: [TM, K] bf16 patch rows (pipelined); w_ref: [K, E] bf16 (resident);
    # b_ref: [1, E] f32 (resident).  f32 accumulation on the MXU, f32 bias add,
    # a single down-cast, one lane-dense store.
    acc = jnp.dot(p_ref[...], w_ref[...], preferred_element_type=jnp.float32)
    o_ref[...] = (acc + b_ref[...]).astype(o_ref.dtype)


@functools.partial(
    jax.jit,
    static_argnames=("patch_size", "compute_dtype", "out_dtype", "tm_max",
                     "target_steps"))
def patch_embedding(x, weight, bias, patch_size, *,
                    compute_dtype=jnp.bfloat16, out_dtype=None,
                    tm_max=1024, target_steps=8):
    """x: [B, C, H, W] (NCHW, as in PyTorch). weight: [E, C, P, P]. bias: [E].

    Returns [B, (H//P)*(W//P), E], i.e. Conv2d(C, E, P, stride=P) ->
    flatten(2) -> transpose(1, 2).  Output dtype defaults to compute_dtype
    (bf16) per the perf review; pass out_dtype=jnp.float32 for exact parity
    with the PyTorch dtype.
    """
    B, C, H, W = x.shape
    P = patch_size
    E = weight.shape[0]
    nh, nw = H // P, W // P
    N = nh * nw
    K = C * P * P
    M = B * N
    out_dtype = compute_dtype if out_dtype is None else out_dtype

    # Row tile: smallest MXU-friendly tile that still yields ~target_steps
    # pipeline steps, clamped to [256, tm_max]; never larger than (8-aligned) M.
    tm = _round_up(pl.cdiv(M, target_steps), 256)
    tm = max(256, min(tm, tm_max))
    tm = min(tm, _round_up(M, 8))
    grid = (pl.cdiv(M, tm),)

    # Patch extraction: the single materializing wrapper pass.  The bf16 cast
    # fuses into the transpose copy; inner (C, ph, pw) ordering matches the
    # flattened OIHW conv weight.  Crop mimics the VALID stride-P conv when
    # H or W is not a multiple of P (no-op otherwise).
    x = x[:, :, :nh * P, :nw * P]
    patches = (
        x.astype(compute_dtype)
        .reshape(B, C, nh, P, nw, P)
        .transpose(0, 2, 4, 1, 3, 5)
        .reshape(M, K)
    )

    # Conv weight -> dense projection [K, E] (tiny), bias kept in f32.
    w2d = weight.reshape(E, K).T.astype(compute_dtype)
    b2d = bias.astype(jnp.float32).reshape(1, E)

    cost = pl.CostEstimate(
        flops=2 * M * K * E,
        transcendentals=0,
        bytes_accessed=(
            M * K * patches.dtype.itemsize          # patch rows in
            + K * E * w2d.dtype.itemsize            # weights in (once)
            + E * 4                                 # bias in
            + M * E * jnp.dtype(out_dtype).itemsize # output out
        ),
    )

    out = pl.pallas_call(
        patch_embed_kernel,
        out_shape=jax.ShapeDtypeStruct((M, E), out_dtype),
        grid=grid,
        in_specs=[
            pl.BlockSpec((tm, K), lambda i: (i, 0)),   # pipelined patch rows
            pl.BlockSpec((K, E), lambda i: (0, 0)),    # weights stay resident
            pl.BlockSpec((1, E), lambda i: (0, 0)),    # bias stays resident
        ],
        out_specs=pl.BlockSpec((tm, E), lambda i: (i, 0)),
        compiler_params=pltpu.CompilerParams(
            dimension_semantics=("parallel",),         # megacore-shardable
        ),
        cost_estimate=cost,
    )(patches, w2d, b2d)

    # [M, E] -> [B, N, E] is a free contiguous split (no HBM copy).
    return out.reshape(B, N, E)


if __name__ == "__main__":
    # Small shapes consistent with the module: in_channels is fixed at 3 by
    # the PyTorch spec; B=2, image 16x16, patch 4, embed 32 -> out [2, 16, 32].
    B, C, IMG, P, E = 2, 3, 16, 4, 32

    key = jax.random.PRNGKey(0)
    kx, kw, kb = jax.random.split(key, 3)
    x = jax.random.normal(kx, (B, C, IMG, IMG), dtype=jnp.float32)
    weight = jax.random.normal(kw, (E, C, P, P), dtype=jnp.float32) * 0.02
    bias = jax.random.normal(kb, (E,), dtype=jnp.float32) * 0.02

    out = patch_embedding(x, weight, bias, P)
    out = jax.block_until_ready(out)
    assert out.shape == (B, (IMG // P) ** 2, E), out.shape
    assert out.dtype == jnp.bfloat16, out.dtype
    out_f32 = out.astype(jnp.float32)

    # Reference 1: conv on bf16-quantized inputs (what the MXU actually sees),
    # evaluated in f32 at HIGHEST precision; only the kernel's final bf16
    # rounding of the output separates the two.
    xq = x.astype(jnp.bfloat16).astype(jnp.float32)
    wq = weight.astype(jnp.bfloat16).astype(jnp.float32)
    ref_q = jax.lax.conv_general_dilated(
        xq, wq, window_strides=(P, P), padding="VALID",
        dimension_numbers=("NCHW", "OIHW", "NCHW"),
        precision=jax.lax.Precision.HIGHEST,
    ) + bias.reshape(1, E, 1, 1)
    ref_q = ref_q.reshape(B, E, -1).transpose(0, 2, 1)
    err_q = float(jnp.max(jnp.abs(out_f32 - ref_q)))
    assert jnp.allclose(out_f32, ref_q, atol=1e-2, rtol=1e-2), err_q

    # Reference 2 (looser): full-f32 conv, bounds the bf16 quantization error.
    ref = jax.lax.conv_general_dilated(
        x, weight, window_strides=(P, P), padding="VALID",
        dimension_numbers=("NCHW", "OIHW", "NCHW"),
        precision=jax.lax.Precision.HIGHEST,
    ) + bias.reshape(1, E, 1, 1)
    ref = ref.reshape(B, E, -1).transpose(0, 2, 1)
    err = float(jnp.max(jnp.abs(out_f32 - ref)))
    assert jnp.allclose(out_f32, ref, atol=3e-2, rtol=3e-2), err

    print("KERNEL_OK")
</pallas_src>

<mosaic_0001>
module attributes {stable_mosaic.version = 11 : i64} {
  func.func @patch_embed_kernel(%arg0: i32, %arg1: memref<32x48xbf16, #tpu.memory_space<vmem>>, %arg2: memref<48x32xbf16, #tpu.memory_space<vmem>>, %arg3: memref<1x32xf32, #tpu.memory_space<vmem>>, %arg4: memref<32x32xbf16, #tpu.memory_space<vmem>>) attributes {dimension_semantics = [#tpu.dimension_semantics<parallel>], iteration_bounds = array<i64: 1>, scalar_prefetch = 0 : i64, scratch_operands = 0 : i64, tpu.core_type = #tpu.core_type<tc>, window_params = [{transform_indices = @transform_0, window_bounds = array<i64: 32, 48>}, {pipeline_mode = #tpu.pipeline_mode<synchronous>, transform_indices = @transform_1, window_bounds = array<i64: 48, 32>}, {pipeline_mode = #tpu.pipeline_mode<synchronous>, transform_indices = @transform_2, window_bounds = array<i64: 1, 32>}, {transform_indices = @transform_3, window_bounds = array<i64: 32, 32>}]} {
    %c0 = arith.constant 0 : index
    %c0_0 = arith.constant 0 : index
    %0 = vector.load %arg1[%c0, %c0_0] : memref<32x48xbf16, #tpu.memory_space<vmem>>, vector<32x48xbf16>
    %c0_1 = arith.constant 0 : index
    %c0_2 = arith.constant 0 : index
    %1 = vector.load %arg2[%c0_1, %c0_2] : memref<48x32xbf16, #tpu.memory_space<vmem>>, vector<48x32xbf16>
    %cst = arith.constant dense<0.000000e+00> : vector<32x32xf32>
    %2 = tpu.matmul %0, %1, %cst {dimension_numbers = #tpu.dot_dimension_numbers<[1], [0], [0], [1], [0, 0, 1, 1], [], []>} : vector<32x48xbf16>, vector<48x32xbf16>, vector<32x32xf32> -> vector<32x32xf32>
    %c0_3 = arith.constant 0 : index
    %c0_4 = arith.constant 0 : index
    %3 = vector.load %arg3[%c0_3, %c0_4] : memref<1x32xf32, #tpu.memory_space<vmem>>, vector<1x32xf32>
    %4 = vector.broadcast %3 : vector<1x32xf32> to vector<32x32xf32>
    %5 = arith.addf %2, %4 : vector<32x32xf32>
    %6 = arith.truncf %5 : vector<32x32xf32> to vector<32x32xbf16>
    %c0_5 = arith.constant 0 : index
    %c0_6 = arith.constant 0 : index
    %7 = vector.load %arg4[%c0_5, %c0_6] : memref<32x32xbf16, #tpu.memory_space<vmem>>, vector<32x32xbf16>
    tpu.vector_store %arg4[%c0_5, %c0_6], %6 {strides = array<i32>} : memref<32x32xbf16, #tpu.memory_space<vmem>>, vector<32x32xbf16>,
    return
  }
  func.func @transform_0(%arg0: i32) -> (i32, i32) {
    %c0_i32 = arith.constant 0 : i32
    %c0_i32_0 = arith.constant 0 : i32
    return %arg0, %c0_i32 : i32, i32
  }
  func.func @transform_1(%arg0: i32) -> (i32, i32) {
    %c0_i32 = arith.constant 0 : i32
    %c0_i32_0 = arith.constant 0 : i32
    %c0_i32_1 = arith.constant 0 : i32
    return %c0_i32, %c0_i32_0 : i32, i32
  }
  func.func @transform_2(%arg0: i32) -> (i32, i32) {
    %c0_i32 = arith.constant 0 : i32
    %c0_i32_0 = arith.constant 0 : i32
    %c0_i32_1 = arith.constant 0 : i32
    return %c0_i32, %c0_i32_0 : i32, i32
  }
  func.func @transform_3(%arg0: i32) -> (i32, i32) {
    %c0_i32 = arith.constant 0 : i32
    %c0_i32_0 = arith.constant 0 : i32
    return %arg0, %c0_i32 : i32, i32
  }
}

</mosaic_0001>

<bundles_post_ra>
// kernel: patch_embedding.1
= control target key start
LH: loop header
LB: loop body
LE: loop exit
PB: predicated region body
PF: predicated region fallthrough
CT: control target
= control target key end

     0   :  { %vm61_vm0 = vcmask 392192   ;;  %s274_s0 = inlined_call_operand.vmem [shape: bf16[32,48], index: 0, kind: input, shape index: {}]   ;;  %s275_s1 = inlined_call_operand.vmem [shape: bf16[48,32], index: 1, kind: input, shape index: {}]   ;;  %s276_s2 = inlined_call_operand.vmem [shape: f32[1,32], index: 2, kind: input, shape index: {}]   ;;  %s277_s3 = inlined_call_operand.hbm [shape: bf16[32,32], index: 3, kind: output, shape index: {}]  }
   0x1   :  { %v188_v0 = vld [vmem:[%s275_s1] sm:$0xff]   ;;  %v189_v1 = vld [vmem:[%s275_s1 + $0x8] sm:$0xff]   ;;  %v190_v3 = vld [vmem:[%s275_s1 + $0x10] sm:$0xff]  }
   0x2   :  { %175 = vmatprep.subr.bf16.mxu0 %v188_v0  ;;  %v191_v2 = vld [vmem:[%s274_s0] sm:$0xff]  }
   0x3   :  { %176 = vmatpush3.bf16.msra.mxu0 %v188_v0  ;;  %181 = vmatprep.mubr.msk.bf16.mxu0 %vm61_vm0, %v191_v2 }
   0x4   :  { %177 = vmatprep.subr.bf16.mxu0 %v189_v1 }
   0x5   :  { %8 = vsyncpa [#allocation3], 0  ;;  %v192_v4 = vld [vmem:[%s274_s0 + $0x8] sm:$0xff]   ;;  %v154_v5 = vld [vmem:[%s276_s2] ss:$0 sm:$0xff]  ;;  %vm133_vm1 = vcmask 257024  }
   0x6   :  { %s217_s1 = smov [#allocation2]  }
   0x7   :  { %178 = vmatpush3.bf16.msra.mxu0 %v189_v1  ;;  %s143_s24 = sshll.u32 %s217_s1, 4  ;;  %s144_s24 = int_to_ptr.vmem [resolvable:$true] %s143_s24 }
   0x8   :  { %179 = vmatprep.subr.bf16.mxu0 %v190_v3  ;;  %s193_s0 = scalar_lea.vmem %s144_s24, 256  ;;  %p198_p1 = scmp.lt.s32.totalorder %s144_s24, %s144_s24 }
   0x9   :  { %p194_p0 = scmp.ne.s32.totalorder %s144_s24, %s193_s0  ;;  %p199_p2 = scmp.lt.s32.totalorder %s193_s0, %s193_s0 }
   0xb   :  { %180 = vmatpush3.bf16.msra.mxu0 %v190_v3  ;;  %p200_p3 = por %p199_p2, %p198_p1 }
   0xd   :  { %p201_p4 = pnand %p200_p3, %p194_p0 }
   0xe   :  { %182 = vmatmul.mubr.msk.bf16.vlgmr.msra.gmra.mrb[0].mxu0 %vm61_vm0, %v192_v4 }
  0xe1   :  { %v183_v6 = vpop.f32.mrb[0].mxu0 }
  0xe2   :  { %v111_v7 = vadd.f32 %v183_v6, %v154_v5  ;;  %v102_v8 = vpop.f32.mrb[1].mxu0 }
  0xe3   :  { %v103_v9 = vadd.f32 %v154_v5, %v102_v8  ;;  %v184_v10 = vpop.f32.mrb[2].mxu0 }
  0xe4   :  { %v168_v11 = vpack.c.bf16 %v111_v7, %v111_v7  ;;  %v114_v12 = vadd.f32 %v184_v10, %v154_v5  ;;  %v105_v13 = vpop.f32.mrb[3].mxu0 }
  0xe5   :  { %v166_v14 = vpack.c.bf16 %v103_v9, %v103_v9  ;;  %v106_v15 = vadd.f32 %v154_v5, %v105_v13 }
  0xe6   :  { %136 = vst.msk [vmem:[#allocation2 + $0x8] sm:$0xf] %vm133_vm1, %v168_v11  ;;  %v169_v16 = vpack.c.bf16 %v114_v12, %v114_v12 }
  0xe7   :  { %134 = vst.msk [vmem:[#allocation2] sm:$0xf] %vm133_vm1, %v166_v14  ;;  %v167_v17 = vpack.c.bf16 %v106_v15, %v106_v15 }
  0xe8   :  { %137 = vst.msk [vmem:[#allocation2 + $0xc] sm:$0xf] %vm133_vm1, %v169_v16 }
  0xe9   :  { %135 = vst.msk [vmem:[#allocation2 + $0x4] sm:$0xf] %vm133_vm1, %v167_v17 }
  0xea   :  { %204 = shalt.err (!%p201_p4)
}
  0xeb   :  { %s205_s26 = scalar_lea.hbm %s277_s3, 256 }
  0xec   :  { %p206_p5 = scmp.ne.s32.totalorder %s277_s3, %s205_s26  ;;  %p209_p6 = scmp.lt.u32.totalorder %s205_s26, %s277_s3 }
  0xee   :  { %p211_p7 = pnand %p209_p6, %p206_p5 }
  0xf0   :  { %214 = shalt.err (!%p211_p7)
}
  0xf1   :  { %s218_s4 = smov 64   ;;  %s219_s5 = smov 4  }
  0xf2   :  { %149 = dma.vmem_to_hbm [thread:$0]  %s144_s24, 256, %s277_s3, [#allocation3], %s218_s4, %s218_s4, %s219_s5  }
  0xf3   :  { %215 = dma.done.wait [#allocation3], 256  }
  0xf4   :  { %216 = vsyncadd [#allocation3], 4294967040 }
  0xf5   :  { %153 = vsyncpa [#allocation3], 1 }

</bundles_post_ra>
